<compile_context>
chip_gen: v7x
topology: tpu7x:2x2x1
jax: 0.10.0
libtpu: 0.0.40
codegen_flags: <defaults>
</compile_context>

<pallas_src>
import jax
import jax.numpy as jnp
from jax.experimental import pallas as pl
from jax.experimental.pallas import tpu as pltpu

INPUT_SIZE = 1
HIDDEN = 100          # logical hidden size (matches the PyTorch module)
HIDDEN_PAD = 128      # padded to a full sublane-tile / MXU width
OUTPUT_SIZE = 1
LANE = 128


def _round_up(a, b):
    return (a + b - 1) // b * b


def mlp_kernel(x_ref, w1_ref, b1_ref, w2t_ref, b2_ref, w3_ref, b3_ref, o_ref):
    # Layer 1: K=1 contraction == rank-1 outer product -> VPU broadcast mul.
    #   (HP, 1) * (1, TM) + (HP, 1) -> (HP, TM)
    h1 = jnp.tanh(w1_ref[...] * x_ref[...] + b1_ref[...])

    # Layer 2: dense (HP, HP) @ (HP, TM) on the MXU, f32 accumulate.
    h2 = jnp.tanh(
        jnp.dot(w2t_ref[...], h1, preferred_element_type=jnp.float32) + b2_ref[...]
    )

    # Layer 3: output width 1 -> weighted reduction over the hidden (sublane)
    # axis; cheap VPU adds + small sublane reduce, result is lane-dense (1, TM).
    # The scalar bias b3 is read from SMEM.
    o_ref[...] = jnp.sum(h2 * w3_ref[...], axis=0, keepdims=True) + b3_ref[0, 0]


def _batch_dim_semantics():
    # On v7x only CORE_PARALLEL actually shards the grid across the 2 TCs;
    # "parallel" vs "arbitrary" barely changes codegen elsewhere.
    try:
        kind = jax.devices()[0].device_kind.lower()
    except Exception:
        kind = ""
    if "v7" in kind:
        return (pltpu.CORE_PARALLEL,)
    return ("parallel",)


def general_nn_forward(x, w1, b1, w2, b2, w3, b3, *, tm=4096):
    """x: (N, 1) f32 -> (N, 1) f32.  Params are in the logical (unpadded)
    layout produced by init_params; padding / transposition happens here."""
    n = x.shape[0]
    hp = HIDDEN_PAD
    tm = max(LANE, tm - tm % LANE)          # lane-aligned tile size

    # Batch tiling along the lane axis: pad N to a lane multiple, then split
    # into num_tiles near-equal 128-aligned tiles (no whole extra padded tile).
    n_lanes = _round_up(n, LANE)
    num_tiles = pl.cdiv(n_lanes, tm)
    tm_eff = _round_up(-(-n_lanes // num_tiles), LANE)
    n_pad = tm_eff * num_tiles

    # Lane-dense input row.  Padded batch lanes compute garbage that is never
    # read back (each batch element is independent) and is sliced off below.
    x_row = jnp.zeros((1, n_pad), jnp.float32).at[0, :n].set(x[:, 0])

    # Hidden dim zero-padded 100 -> 128 along sublanes.  Padded weight rows /
    # bias entries are 0, so tanh(0) = 0 keeps padded hidden rows inert.
    w1c = jnp.zeros((hp, INPUT_SIZE), jnp.float32).at[:HIDDEN, :].set(w1.T)
    b1c = jnp.zeros((hp, 1), jnp.float32).at[:HIDDEN, :].set(b1.reshape(HIDDEN, 1))
    w2t = jnp.zeros((hp, hp), jnp.float32).at[:HIDDEN, :HIDDEN].set(w2.T)
    b2c = jnp.zeros((hp, 1), jnp.float32).at[:HIDDEN, :].set(b2.reshape(HIDDEN, 1))
    w3c = jnp.zeros((hp, 1), jnp.float32).at[:HIDDEN, :].set(w3.reshape(HIDDEN, 1))
    # b3 stays (1, 1) and is passed via SMEM.

    const2 = lambda i: (0, 0)   # weights/biases stay VMEM-resident across steps

    out = pl.pallas_call(
        mlp_kernel,
        out_shape=jax.ShapeDtypeStruct((1, n_pad), jnp.float32),
        grid=(num_tiles,),
        in_specs=[
            pl.BlockSpec((1, tm_eff), lambda i: (0, i)),        # x (lane-dense batch)
            pl.BlockSpec((hp, INPUT_SIZE), const2),             # w1 column
            pl.BlockSpec((hp, 1), const2),                      # b1 column
            pl.BlockSpec((hp, hp), const2),                     # w2^T
            pl.BlockSpec((hp, 1), const2),                      # b2 column
            pl.BlockSpec((hp, 1), const2),                      # w3 column
            pl.BlockSpec(memory_space=pltpu.MemorySpace.SMEM),  # b3 scalar
        ],
        out_specs=pl.BlockSpec((1, tm_eff), lambda i: (0, i)),
        compiler_params=pltpu.CompilerParams(
            dimension_semantics=_batch_dim_semantics(),
        ),
    )(x_row, w1c, b1c, w2t, b2c, w3c, b3)

    return out[0, :n].reshape(n, OUTPUT_SIZE)


def init_params(key):
    """PyTorch-Linear-style uniform(-1/sqrt(fan_in), 1/sqrt(fan_in)) init,
    stored as (in, out) so the logical forward computes y = x @ W + b."""
    ks = jax.random.split(key, 6)

    def uniform(k, shape, fan_in):
        bound = 1.0 / jnp.sqrt(jnp.float32(fan_in))
        return jax.random.uniform(k, shape, jnp.float32, -bound, bound)

    w1 = uniform(ks[0], (INPUT_SIZE, HIDDEN), INPUT_SIZE)
    b1 = uniform(ks[1], (1, HIDDEN), INPUT_SIZE)
    w2 = uniform(ks[2], (HIDDEN, HIDDEN), HIDDEN)
    b2 = uniform(ks[3], (1, HIDDEN), HIDDEN)
    w3 = uniform(ks[4], (HIDDEN, OUTPUT_SIZE), HIDDEN)
    b3 = uniform(ks[5], (1, OUTPUT_SIZE), HIDDEN)
    return w1, b1, w2, b2, w3, b3


def reference_forward(x, w1, b1, w2, b2, w3, b3):
    h1 = jnp.tanh(x @ w1 + b1)
    h2 = jnp.tanh(h1 @ w2 + b2)
    return h2 @ w3 + b3


if __name__ == "__main__":
    key = jax.random.PRNGKey(0)
    kx, kp = jax.random.split(key)

    N = 8
    x = jax.random.normal(kx, (N, INPUT_SIZE), jnp.float32)
    params = init_params(kp)

    y = general_nn_forward(x, *params)
    y = jax.block_until_ready(y)

    y_ref = reference_forward(x, *params)
    assert y.shape == (N, OUTPUT_SIZE)
    assert jnp.allclose(y, y_ref, atol=1e-5, rtol=1e-5)

    print("KERNEL_OK")
</pallas_src>

<mosaic_0001>
module attributes {stable_mosaic.version = 11 : i64} {
  func.func @mlp_kernel(%arg0: i32, %arg1: memref<1x128xf32, #tpu.memory_space<vmem>>, %arg2: memref<128x1xf32, #tpu.memory_space<vmem>>, %arg3: memref<128x1xf32, #tpu.memory_space<vmem>>, %arg4: memref<128x128xf32, #tpu.memory_space<vmem>>, %arg5: memref<128x1xf32, #tpu.memory_space<vmem>>, %arg6: memref<128x1xf32, #tpu.memory_space<vmem>>, %arg7: memref<1x1xf32, #tpu.memory_space<smem>>, %arg8: memref<1x128xf32, #tpu.memory_space<vmem>>) attributes {dimension_semantics = [#tpu.dimension_semantics<parallel>], iteration_bounds = array<i64: 1>, scalar_prefetch = 0 : i64, scratch_operands = 0 : i64, tpu.core_type = #tpu.core_type<tc>, window_params = [{transform_indices = @transform_0, window_bounds = array<i64: 1, 128>}, {pipeline_mode = #tpu.pipeline_mode<synchronous>, transform_indices = @transform_1, window_bounds = array<i64: 128, 1>}, {pipeline_mode = #tpu.pipeline_mode<synchronous>, transform_indices = @transform_2, window_bounds = array<i64: 128, 1>}, {pipeline_mode = #tpu.pipeline_mode<synchronous>, transform_indices = @transform_3, window_bounds = array<i64: 128, 128>}, {pipeline_mode = #tpu.pipeline_mode<synchronous>, transform_indices = @transform_4, window_bounds = array<i64: 128, 1>}, {pipeline_mode = #tpu.pipeline_mode<synchronous>, transform_indices = @transform_5, window_bounds = array<i64: 128, 1>}, {transform_indices = @transform_6, window_bounds = array<i64: 1, 1>}, {transform_indices = @transform_7, window_bounds = array<i64: 1, 128>}]} {
    %c0 = arith.constant 0 : index
    %c0_0 = arith.constant 0 : index
    %0 = vector.load %arg2[%c0, %c0_0] : memref<128x1xf32, #tpu.memory_space<vmem>>, vector<128x1xf32>
    %c0_1 = arith.constant 0 : index
    %c0_2 = arith.constant 0 : index
    %1 = vector.load %arg1[%c0_1, %c0_2] : memref<1x128xf32, #tpu.memory_space<vmem>>, vector<1x128xf32>
    %2 = vector.broadcast %0 : vector<128x1xf32> to vector<128x128xf32>
    %3 = vector.broadcast %1 : vector<1x128xf32> to vector<128x128xf32>
    %4 = arith.mulf %2, %3 : vector<128x128xf32>
    %c0_3 = arith.constant 0 : index
    %c0_4 = arith.constant 0 : index
    %5 = vector.load %arg3[%c0_3, %c0_4] : memref<128x1xf32, #tpu.memory_space<vmem>>, vector<128x1xf32>
    %6 = vector.broadcast %5 : vector<128x1xf32> to vector<128x128xf32>
    %7 = arith.addf %4, %6 : vector<128x128xf32>
    %8 = math.tanh %7 : vector<128x128xf32>
    %c0_5 = arith.constant 0 : index
    %c0_6 = arith.constant 0 : index
    %9 = vector.load %arg4[%c0_5, %c0_6] : memref<128x128xf32, #tpu.memory_space<vmem>>, vector<128x128xf32>
    %cst = arith.constant dense<0.000000e+00> : vector<128x128xf32>
    %10 = tpu.matmul %9, %8, %cst {dimension_numbers = #tpu.dot_dimension_numbers<[1], [0], [0], [1], [0, 0, 1, 1], [], []>} : vector<128x128xf32>, vector<128x128xf32>, vector<128x128xf32> -> vector<128x128xf32>
    %c0_7 = arith.constant 0 : index
    %c0_8 = arith.constant 0 : index
    %11 = vector.load %arg5[%c0_7, %c0_8] : memref<128x1xf32, #tpu.memory_space<vmem>>, vector<128x1xf32>
    %12 = vector.broadcast %11 : vector<128x1xf32> to vector<128x128xf32>
    %13 = arith.addf %10, %12 : vector<128x128xf32>
    %14 = math.tanh %13 : vector<128x128xf32>
    %c0_9 = arith.constant 0 : index
    %c0_10 = arith.constant 0 : index
    %15 = vector.load %arg6[%c0_9, %c0_10] : memref<128x1xf32, #tpu.memory_space<vmem>>, vector<128x1xf32>
    %16 = vector.broadcast %15 : vector<128x1xf32> to vector<128x128xf32>
    %17 = arith.mulf %14, %16 : vector<128x128xf32>
    %cst_11 = arith.constant dense<0.000000e+00> : vector<128xf32>
    %18 = vector.multi_reduction <add>, %17, %cst_11 [0] : vector<128x128xf32> to vector<128xf32>
    %19 = vector.shape_cast %18 : vector<128xf32> to vector<1x128xf32>
    %c0_12 = arith.constant 0 : index
    %c0_13 = arith.constant 0 : index
    %20 = memref.load %arg7[%c0_12, %c0_13] : memref<1x1xf32, #tpu.memory_space<smem>>
    %21 = vector.broadcast %20 : f32 to vector<1x128xf32>
    %22 = arith.addf %19, %21 : vector<1x128xf32>
    %c0_14 = arith.constant 0 : index
    %c0_15 = arith.constant 0 : index
    %23 = vector.load %arg8[%c0_14, %c0_15] : memref<1x128xf32, #tpu.memory_space<vmem>>, vector<1x128xf32>
    tpu.vector_store %arg8[%c0_14, %c0_15], %22 {strides = array<i32>} : memref<1x128xf32, #tpu.memory_space<vmem>>, vector<1x128xf32>,
    return
  }
  func.func @transform_0(%arg0: i32) -> (i32, i32) {
    %c0_i32 = arith.constant 0 : i32
    %c0_i32_0 = arith.constant 0 : i32
    return %c0_i32, %arg0 : i32, i32
  }
  func.func @transform_1(%arg0: i32) -> (i32, i32) {
    %c0_i32 = arith.constant 0 : i32
    %c0_i32_0 = arith.constant 0 : i32
    %c0_i32_1 = arith.constant 0 : i32
    return %c0_i32, %c0_i32_0 : i32, i32
  }
  func.func @transform_2(%arg0: i32) -> (i32, i32) {
    %c0_i32 = arith.constant 0 : i32
    %c0_i32_0 = arith.constant 0 : i32
    %c0_i32_1 = arith.constant 0 : i32
    return %c0_i32, %c0_i32_0 : i32, i32
  }
  func.func @transform_3(%arg0: i32) -> (i32, i32) {
    %c0_i32 = arith.constant 0 : i32
    %c0_i32_0 = arith.constant 0 : i32
    %c0_i32_1 = arith.constant 0 : i32
    return %c0_i32, %c0_i32_0 : i32, i32
  }
  func.func @transform_4(%arg0: i32) -> (i32, i32) {
    %c0_i32 = arith.constant 0 : i32
    %c0_i32_0 = arith.constant 0 : i32
    %c0_i32_1 = arith.constant 0 : i32
    return %c0_i32, %c0_i32_0 : i32, i32
  }
  func.func @transform_5(%arg0: i32) -> (i32, i32) {
    %c0_i32 = arith.constant 0 : i32
    %c0_i32_0 = arith.constant 0 : i32
    %c0_i32_1 = arith.constant 0 : i32
    return %c0_i32, %c0_i32_0 : i32, i32
  }
  func.func @transform_6(%arg0: i32) -> (i32, i32) {
    %c0_i32 = arith.constant 0 : i32
    %c0_i32_0 = arith.constant 0 : i32
    %c0_i32_1 = arith.constant 0 : i32
    return %c0_i32, %c0_i32_0 : i32, i32
  }
  func.func @transform_7(%arg0: i32) -> (i32, i32) {
    %c0_i32 = arith.constant 0 : i32
    %c0_i32_0 = arith.constant 0 : i32
    return %c0_i32, %arg0 : i32, i32
  }
}

</mosaic_0001>

<bundles_post_ra>
// kernel: tpu_custom_call.1
= control target key start
LH: loop header
LB: loop body
LE: loop exit
PB: predicated region body
PF: predicated region fallthrough
CT: control target
= control target key end

     0   :  { %v928_v2 = vmov 0   ;;  %s1249_s0 = inlined_call_operand.vmem [shape: f32[1,128], index: 0, kind: input, shape index: {}]   ;;  %s1250_s1 = inlined_call_operand.vmem [shape: f32[128,1], index: 1, kind: input, shape index: {}]   ;;  %s1251_s2 = inlined_call_operand.vmem [shape: f32[128,1], index: 2, kind: input, shape index: {}]   ;;  %s1252_s3 = inlined_call_operand.vmem [shape: f32[128,128], index: 3, kind: input, shape index: {}]   ;;  %s1253_s4 = inlined_call_operand.vmem [shape: f32[128,1], index: 4, kind: input, shape index: {}]   ;;  %s1254_s5 = inlined_call_operand.vmem [shape: f32[128,1], index: 5, kind: input, shape index: {}]   ;;  %s1255_s6 = inlined_call_operand.<no memory space> [shape: f32[1,1], index: 6, kind: input, shape index: {}]   ;;  %s1256_s7 = inlined_call_operand.hbm [shape: f32[1,128], index: 7, kind: output, shape index: {}]  }
   0x1   :  { %v147_v0 = vld [vmem:[%s1251_s2] sm:$0xff]  ;;  %839 = vset.pattern.permute.xlu1 %v928_v2  ;;  %838 = vset.pattern.permute.xlu0 %v928_v2  ;;  %v148_v3 = vld [vmem:[%s1251_s2 + $0x8] sm:$0xff]  ;;  %v31_v5 = vld [vmem:[%s1250_s1 + $0x18] sm:$0xff] }
   0x2   :  { %v28_v1 = vld [vmem:[%s1250_s1] sm:$0xff]  ;;  %165 = vperm.xlu1 %839, %v147_v0   ;;  %v29_v4 = vld [vmem:[%s1250_s1 + $0x8] sm:$0xff]  ;;  %v30_v6 = vld [vmem:[%s1250_s1 + $0x10] sm:$0xff] }
   0x3   :  { %47 = vperm.xlu0 %838, %v28_v1   ;;  %v150_v7 = vld [vmem:[%s1251_s2 + $0x18] sm:$0xff]  ;;  %v149_v8 = vld [vmem:[%s1251_s2 + $0x10] sm:$0xff]  ;;  %v33_v9 = vld [vmem:[%s1250_s1 + $0x28] sm:$0xff] }
   0x4   :  { %v32_v10 = vld [vmem:[%s1250_s1 + $0x20] sm:$0xff]  ;;  %v152_v11 = vld [vmem:[%s1251_s2 + $0x28] sm:$0xff] }
   0x5   :  { %v151_v12 = vld [vmem:[%s1251_s2 + $0x20] sm:$0xff] }
   0x6   :  { %170 = vperm.xlu1 %839, %v148_v3  }
   0x7   :  { %52 = vperm.xlu0 %838, %v29_v4  }
   0xa   :  { %62 = vperm.xlu1 %839, %v31_v5  }
   0xb   :  { %57 = vperm.xlu0 %838, %v30_v6  }
   0xe   :  { %180 = vperm.xlu1 %839, %v150_v7  }
   0xf   :  { %175 = vperm.xlu0 %838, %v149_v8  }
  0x12   :  { %72 = vperm.xlu1 %839, %v33_v9  }
  0x13   :  { %67 = vperm.xlu0 %838, %v32_v10  }
  0x14   :  { %13 = vsyncpa [#allocation4], 0  ;;  %v35_v13 = vld [vmem:[%s1250_s1 + $0x38] sm:$0xff]  ;;  %v34_v14 = vld [vmem:[%s1250_s1 + $0x30] sm:$0xff] }
  0x15   :  { %v154_v15 = vld [vmem:[%s1251_s2 + $0x38] sm:$0xff]  ;;  %v153_v16 = vld [vmem:[%s1251_s2 + $0x30] sm:$0xff]  ;;  %v37_v17 = vld [vmem:[%s1250_s1 + $0x48] sm:$0xff] }
  0x16   :  { %190 = vperm.xlu1 %839, %v152_v11   ;;  %v36_v18 = vld [vmem:[%s1250_s1 + $0x40] sm:$0xff]  ;;  %v156_v19 = vld [vmem:[%s1251_s2 + $0x48] sm:$0xff]  ;;  %v39_v21 = vld [vmem:[%s1250_s1 + $0x58] sm:$0xff] }
  0x17   :  { %185 = vperm.xlu0 %838, %v151_v12   ;;  %v155_v20 = vld [vmem:[%s1251_s2 + $0x40] sm:$0xff]  ;;  %v38_v22 = vld [vmem:[%s1250_s1 + $0x50] sm:$0xff]  ;;  %v158_v23 = vld [vmem:[%s1251_s2 + $0x58] sm:$0xff] }
  0x18   :  { %v157_v24 = vld [vmem:[%s1251_s2 + $0x50] sm:$0xff]  ;;  %v41_v25 = vld [vmem:[%s1250_s1 + $0x68] sm:$0xff]  ;;  %v40_v26 = vld [vmem:[%s1250_s1 + $0x60] sm:$0xff] }
  0x19   :  { %v160_v27 = vld [vmem:[%s1251_s2 + $0x68] sm:$0xff]  ;;  %v159_v28 = vld [vmem:[%s1251_s2 + $0x60] sm:$0xff]  ;;  %v43_v29 = vld [vmem:[%s1250_s1 + $0x78] sm:$0xff] }
  0x1a   :  { %82 = vperm.xlu1 %839, %v35_v13   ;;  %v42_v30 = vld [vmem:[%s1250_s1 + $0x70] sm:$0xff]  ;;  %v162_v31 = vld [vmem:[%s1251_s2 + $0x78] sm:$0xff]  ;;  %v292_v33 = vld [vmem:[%s1253_s4 + $0x8] sm:$0xff] }
  0x1b   :  { %77 = vperm.xlu0 %838, %v34_v14   ;;  %v161_v32 = vld [vmem:[%s1251_s2 + $0x70] sm:$0xff]  ;;  %v291_v34 = vld [vmem:[%s1253_s4] sm:$0xff]  ;;  %v294_v35 = vld [vmem:[%s1253_s4 + $0x18] sm:$0xff] }
  0x1c   :  { %v293_v36 = vld [vmem:[%s1253_s4 + $0x10] sm:$0xff]  ;;  %v296_v37 = vld [vmem:[%s1253_s4 + $0x28] sm:$0xff]  ;;  %v295_v38 = vld [vmem:[%s1253_s4 + $0x20] sm:$0xff] }
  0x1d   :  { %v298_v39 = vld [vmem:[%s1253_s4 + $0x38] sm:$0xff]  ;;  %v297_v40 = vld [vmem:[%s1253_s4 + $0x30] sm:$0xff]  ;;  %v549_v41 = vld [vmem:[%s1254_s5 + $0x8] sm:$0xff] }
  0x1e   :  { %200 = vperm.xlu1 %839, %v154_v15   ;;  %v548_v42 = vld [vmem:[%s1254_s5] sm:$0xff]  ;;  %v550_v45 = vld [vmem:[%s1254_s5 + $0x10] sm:$0xff]  ;;  %v551_v47 = vld [vmem:[%s1254_s5 + $0x18] sm:$0xff] }
  0x1f   :  { %195 = vperm.xlu0 %838, %v153_v16   ;;  %v275_v43 = vld [vmem:[%s1252_s3] sm:$0xff]  ;;  %v300_v48 = vld [vmem:[%s1253_s4 + $0x48] sm:$0xff]  ;;  %v301_v50 = vld [vmem:[%s1253_s4 + $0x50] sm:$0xff] }
  0x20   :  { %v283_v44 = vld [vmem:[%s1252_s3 + $0x40] sm:$0xff]  ;;  %764 = vmatprep.mubr.f32.mxu0 %v275_v43  ;;  %v553_v51 = vld [vmem:[%s1254_s5 + $0x28] sm:$0xff]  ;;  %v302_v52 = vld [vmem:[%s1253_s4 + $0x58] sm:$0xff] }
  0x21   :  { %776 = vmatprep.mubr.f32.mxu1 %v283_v44  ;;  %v299_v46 = vld [vmem:[%s1253_s4 + $0x40] sm:$0xff]  ;;  %v554_v53 = vld [vmem:[%s1254_s5 + $0x30] sm:$0xff]  ;;  %v555_v55 = vld [vmem:[%s1254_s5 + $0x38] sm:$0xff] }
  0x22   :  { %92 = vperm.xlu1 %839, %v37_v17   ;;  %v552_v49 = vld [vmem:[%s1254_s5 + $0x20] sm:$0xff]  ;;  %v304_v56 = vld [vmem:[%s1253_s4 + $0x68] sm:$0xff]  ;;  %v305_v58 = vld [vmem:[%s1253_s4 + $0x70] sm:$0xff] }
  0x23   :  { %87 = vperm.xlu0 %838, %v36_v18   ;;  %v303_v54 = vld [vmem:[%s1253_s4 + $0x60] sm:$0xff]  ;;  %v557_v59 = vld [vmem:[%s1254_s5 + $0x48] sm:$0xff]  ;;  %v306_v60 = vld [vmem:[%s1253_s4 + $0x78] sm:$0xff] }
  0x24   :  { %v556_v57 = vld [vmem:[%s1254_s5 + $0x40] sm:$0xff]  ;;  %v559_v61 = vld [vmem:[%s1254_s5 + $0x58] sm:$0xff]  ;;  %v558_v62 = vld [vmem:[%s1254_s5 + $0x50] sm:$0xff] }
  0x25   :  { %v561_v63 = vld [vmem:[%s1254_s5 + $0x68] sm:$0xff]  ;;  %v560_v0 = vld [vmem:[%s1254_s5 + $0x60] sm:$0xff]  ;;  %v563_v1 = vld [vmem:[%s1254_s5 + $0x78] sm:$0xff] }
  0x26   :  { %210 = vperm.xlu1 %839, %v156_v19   ;;  %v562_v2 = vld [vmem:[%s1254_s5 + $0x70] sm:$0xff]  ;;  %v1171_v3 = vld [vmem:[%s1249_s0] ss:$0 sm:$0xff]  ;;  %s929_s5 = smov [#allocation3]  }
  0x27   :  { %205 = vperm.xlu0 %838, %v155_v20   ;;  %s691_s13 = sshll.u32 %s929_s5, 4  ;;  %s692_s13 = int_to_ptr.vmem [resolvable:$true] %s691_s13 }
  0x28   :  { %s904_s14 = scalar_lea.vmem %s692_s13, 16  ;;  %s908_s15 = scalar_lea.vmem %s692_s13, 32 }
  0x29   :  { %p905_p0 = scmp.ne.s32.totalorder %s692_s13, %s904_s14  ;;  %p909_p1 = scmp.lt.s32.totalorder %s692_s13, %s692_s13 }
  0x2a   :  { %102 = vperm.xlu1 %839, %v39_v21   ;;  %p910_p2 = scmp.lt.s32.totalorder %s908_s15, %s904_s14 }
  0x2b   :  { %97 = vperm.xlu0 %838, %v38_v22  }
  0x2c   :  { %p911_p3 = por %p910_p2, %p909_p1 }
  0x2e   :  { %220 = vperm.xlu1 %839, %v158_v23   ;;  %p912_p4 = pnand %p911_p3, %p905_p0 }
  0x2f   :  { %215 = vperm.xlu0 %838, %v157_v24  }
  0x32   :  { %112 = vperm.xlu1 %839, %v41_v25  }
  0x33   :  { %107 = vperm.xlu0 %838, %v40_v26  }
  0x36   :  { %230 = vperm.xlu1 %839, %v160_v27  }
  0x37   :  { %225 = vperm.xlu0 %838, %v159_v28  }
  0x3a   :  { %122 = vperm.xlu1 %839, %v43_v29  }
  0x3b   :  { %117 = vperm.xlu0 %838, %v42_v30  }
  0x3e   :  { %240 = vperm.xlu1 %839, %v162_v31  }
  0x3f   :  { %235 = vperm.xlu0 %838, %v161_v32  }
  0x42   :  { %314 = vperm.xlu1 %839, %v292_v33  }
  0x43   :  { %309 = vperm.xlu0 %838, %v291_v34  }
  0x46   :  { %324 = vperm.xlu1 %839, %v294_v35  }
  0x47   :  { %319 = vperm.xlu0 %838, %v293_v36  }
  0x4a   :  { %334 = vperm.xlu1 %839, %v296_v37  }
  0x4b   :  { %329 = vperm.xlu0 %838, %v295_v38  }
  0x4e   :  { %344 = vperm.xlu1 %839, %v298_v39  }
  0x4f   :  { %339 = vperm.xlu0 %838, %v297_v40  }
  0x52   :  { %571 = vperm.xlu1 %839, %v549_v41  }
  0x53   :  { %566 = vperm.xlu0 %838, %v548_v42  }
  0x56   :  { %576 = vperm.xlu1 %839, %v550_v45  }
  0x57   :  { %349 = vperm.xlu0 %838, %v299_v46  }
  0x5a   :  { %581 = vperm.xlu1 %839, %v551_v47  }
  0x5b   :  { %354 = vperm.xlu0 %838, %v300_v48  }
  0x5e   :  { %586 = vperm.xlu1 %839, %v552_v49  }
  0x5f   :  { %359 = vperm.xlu0 %838, %v301_v50  }
  0x62   :  { %591 = vperm.xlu1 %839, %v553_v51  }
  0x63   :  { %364 = vperm.xlu0 %838, %v302_v52  }
  0x66   :  { %596 = vperm.xlu1 %839, %v554_v53  }
  0x67   :  { %369 = vperm.xlu0 %838, %v303_v54  }
  0x6a   :  { %601 = vperm.xlu1 %839, %v555_v55  }
  0x6b   :  { %374 = vperm.xlu0 %838, %v304_v56  }
  0x6e   :  { %606 = vperm.xlu1 %839, %v556_v57  }
  0x6f   :  { %379 = vperm.xlu0 %838, %v305_v58  }
  0x72   :  { %611 = vperm.xlu1 %839, %v557_v59  }
  0x73   :  { %384 = vperm.xlu0 %838, %v306_v60  }
  0x76   :  { %621 = vperm.xlu1 %839, %v559_v61  }
  0x77   :  { %616 = vperm.xlu0 %838, %v558_v62  }
  0x7a   :  { %631 = vperm.xlu1 %839, %v561_v63  }
  0x7b   :  { %626 = vperm.xlu0 %838, %v560_v0  }
  0x7e   :  { %641 = vperm.xlu1 %839, %v563_v1  }
  0x7f   :  { %636 = vperm.xlu0 %838, %v562_v2  }
  0x81   :  { %v166_v4 = vpop.permute.xlu1 %165 }
  0x82   :  { %v48_v5 = vpop.permute.xlu0 %47 }
  0x83   :  { %v131_v6 = vmul.f32 %v1171_v3, %v48_v5 }
  0x85   :  { %v243_v7 = vadd.f32 %v166_v4, %v131_v6  ;;  %v171_v8 = vpop.permute.xlu1 %170 }
  0x86   :  { %v53_v9 = vpop.permute.xlu0 %52 }
  0x87   :  { %v132_v10 = vmul.f32 %v1171_v3, %v53_v9  ;;  %840 = vtanh.f32 %v243_v7 }
  0x89   :  { %v244_v11 = vadd.f32 %v171_v8, %v132_v10  ;;  %v63_v12 = vpop.permute.xlu1 %62 }
  0x8a   :  { %v58_v13 = vpop.permute.xlu0 %57  ;;  %v134_v14 = vmul.f32 %v1171_v3, %v63_v12 }
  0x8b   :  { %842 = vtanh.f32 %v244_v11  ;;  %v133_v15 = vmul.f32 %v1171_v3, %v58_v13 }
  0x8d   :  { %v181_v16 = vpop.permute.xlu1 %180 }
  0x8e   :  { %v176_v17 = vpop.permute.xlu0 %175  ;;  %v246_v18 = vadd.f32 %v181_v16, %v134_v14 }
  0x8f   :  { %v245_v19 = vadd.f32 %v176_v17, %v133_v15 }
  0x90   :  { %844 = vtanh.f32 %v246_v18 }
  0x91   :  { %846 = vtanh.f32 %v245_v19  ;;  %v73_v20 = vpop.permute.xlu1 %72  ;;  %v841_v22 = vpop.eup %840 }
  0x92   :  { %v68_v21 = vpop.permute.xlu0 %67  ;;  %v136_v24 = vmul.f32 %v1171_v3, %v73_v20 }
  0x93   :  { %v135_v25 = vmul.f32 %v1171_v3, %v68_v21 }
  0x95   :  { %v843_v23 = vpop.eup %842  ;;  %v191_v26 = vpop.permute.xlu1 %190 }
  0x96   :  { %v186_v27 = vpop.permute.xlu0 %185  ;;  %v788_v28 = vpack.c.bf16 %v843_v23, %v841_v22  ;;  %v248_v29 = vadd.f32 %v191_v26, %v136_v24 }
  0x97   :  { %v247_v30 = vadd.f32 %v186_v27, %v135_v25 }
  0x98   :  { %789 = vmatprep.subr.bf16.mxu0 %v788_v28  ;;  %820 = vmatprep.subr.bf16.mxu1 %v788_v28  ;;  %848 = vtanh.f32 %v248_v29  ;;  %v284_v29 = vld [vmem:[%s1252_s3 + $0x48] sm:$0xff] }
  0x99   :  { %791 = vmatpush3.bf16.msra.mxu0 %v788_v28  ;;  %828 = vmatpush3.bf16.msra.mxu1 %v788_v28  ;;  %850 = vtanh.f32 %v247_v30  ;;  %v83_v31 = vpop.permute.xlu1 %82  ;;  %v276_v28 = vld [vmem:[%s1252_s3 + $0x8] sm:$0xff]  ;;  %v277_v30 = vld [vmem:[%s1252_s3 + $0x10] sm:$0xff] }
  0x9a   :  { %v78_v32 = vpop.permute.xlu0 %77  ;;  %v845_v33 = vpop.eup %844  ;;  %v138_v35 = vmul.f32 %v1171_v3, %v83_v31  ;;  %v285_v31 = vld [vmem:[%s1252_s3 + $0x50] sm:$0xff] }
  0x9b   :  { %v847_v34 = vpop.eup %846  ;;  %v137_v36 = vmul.f32 %v1171_v3, %v78_v32  ;;  %v278_v32 = vld [vmem:[%s1252_s3 + $0x18] sm:$0xff] }
  0x9c   :  { %v792_v37 = vpack.c.bf16 %v845_v33, %v847_v34  ;;  %v286_v33 = vld [vmem:[%s1252_s3 + $0x58] sm:$0xff]  ;;  %v279_v34 = vld [vmem:[%s1252_s3 + $0x20] sm:$0xff] }
  0x9d   :  { %v201_v38 = vpop.permute.xlu1 %200 }
  0x9e   :  { %v196_v39 = vpop.permute.xlu0 %195  ;;  %v250_v40 = vadd.f32 %v201_v38, %v138_v35  ;;  %793 = vmatprep.subr.bf16.mxu0 %v792_v37  ;;  %821 = vmatprep.subr.bf16.mxu1 %v792_v37  ;;  %v287_v35 = vld [vmem:[%s1252_s3 + $0x60] sm:$0xff]  ;;  %v281_v38 = vld [vmem:[%s1252_s3 + $0x30] sm:$0xff] }
  0x9f   :  { %v249_v41 = vadd.f32 %v196_v39, %v137_v36  ;;  %795 = vmatpush3.bf16.msra.mxu0 %v792_v37  ;;  %829 = vmatpush3.bf16.msra.mxu1 %v792_v37  ;;  %v280_v36 = vld [vmem:[%s1252_s3 + $0x28] sm:$0xff]  ;;  %v289_v39 = vld [vmem:[%s1252_s3 + $0x70] sm:$0xff] }
  0xa0   :  { %852 = vtanh.f32 %v250_v40  ;;  %v288_v37 = vld [vmem:[%s1252_s3 + $0x68] sm:$0xff]  ;;  %v282_v40 = vld [vmem:[%s1252_s3 + $0x38] sm:$0xff] }
  0xa1   :  { %854 = vtanh.f32 %v249_v41  ;;  %v93_v42 = vpop.permute.xlu1 %92  ;;  %v290_v41 = vld [vmem:[%s1252_s3 + $0x78] sm:$0xff] }
  0xa2   :  { %v88_v43 = vpop.permute.xlu0 %87  ;;  %v849_v44 = vpop.eup %848  ;;  %v140_v46 = vmul.f32 %v1171_v3, %v93_v42 }
  0xa3   :  { %v851_v45 = vpop.eup %850  ;;  %v139_v47 = vmul.f32 %v1171_v3, %v88_v43 }
  0xa4   :  { %v796_v48 = vpack.c.bf16 %v849_v44, %v851_v45 }
  0xa5   :  { %v211_v49 = vpop.permute.xlu1 %210 }
  0xa6   :  { %v206_v50 = vpop.permute.xlu0 %205  ;;  %v252_v51 = vadd.f32 %v211_v49, %v140_v46  ;;  %797 = vmatprep.subr.bf16.mxu0 %v796_v48  ;;  %822 = vmatprep.subr.bf16.mxu1 %v796_v48 }
  0xa7   :  { %v251_v52 = vadd.f32 %v206_v50, %v139_v47  ;;  %799 = vmatpush3.bf16.msra.mxu0 %v796_v48  ;;  %830 = vmatpush3.bf16.msra.mxu1 %v796_v48 }
  0xa8   :  { %856 = vtanh.f32 %v252_v51 }
  0xa9   :  { %858 = vtanh.f32 %v251_v52  ;;  %v103_v53 = vpop.permute.xlu1 %102 }
  0xaa   :  { %v98_v54 = vpop.permute.xlu0 %97  ;;  %v853_v55 = vpop.eup %852  ;;  %v142_v57 = vmul.f32 %v1171_v3, %v103_v53 }
  0xab   :  { %v855_v56 = vpop.eup %854  ;;  %v141_v58 = vmul.f32 %v1171_v3, %v98_v54 }
  0xac   :  { %v800_v59 = vpack.c.bf16 %v853_v55, %v855_v56 }
  0xad   :  { %v221_v60 = vpop.permute.xlu1 %220 }
  0xae   :  { %v216_v61 = vpop.permute.xlu0 %215  ;;  %v254_v62 = vadd.f32 %v221_v60, %v142_v57  ;;  %801 = vmatprep.subr.bf16.mxu0 %v800_v59  ;;  %823 = vmatprep.subr.bf16.mxu1 %v800_v59 }
  0xaf   :  { %v253_v63 = vadd.f32 %v216_v61, %v141_v58  ;;  %803 = vmatpush3.bf16.msra.mxu0 %v800_v59  ;;  %831 = vmatpush3.bf16.msra.mxu1 %v800_v59 }
  0xb0   :  { %860 = vtanh.f32 %v254_v62 }
  0xb1   :  { %862 = vtanh.f32 %v253_v63  ;;  %v113_v0 = vpop.permute.xlu1 %112 }
  0xb2   :  { %v108_v1 = vpop.permute.xlu0 %107  ;;  %v857_v2 = vpop.eup %856  ;;  %v144_v5 = vmul.f32 %v1171_v3, %v113_v0 }
  0xb3   :  { %v859_v4 = vpop.eup %858  ;;  %v143_v6 = vmul.f32 %v1171_v3, %v108_v1 }
  0xb4   :  { %v804_v7 = vpack.c.bf16 %v857_v2, %v859_v4 }
  0xb5   :  { %v231_v8 = vpop.permute.xlu1 %230 }
  0xb6   :  { %v226_v9 = vpop.permute.xlu0 %225  ;;  %v256_v10 = vadd.f32 %v231_v8, %v144_v5  ;;  %805 = vmatprep.subr.bf16.mxu0 %v804_v7  ;;  %824 = vmatprep.subr.bf16.mxu1 %v804_v7 }
  0xb7   :  { %v255_v11 = vadd.f32 %v226_v9, %v143_v6  ;;  %807 = vmatpush3.bf16.msra.mxu0 %v804_v7  ;;  %832 = vmatpush3.bf16.msra.mxu1 %v804_v7 }
  0xb8   :  { %864 = vtanh.f32 %v256_v10 }
  0xb9   :  { %866 = vtanh.f32 %v255_v11  ;;  %v123_v12 = vpop.permute.xlu1 %122 }
  0xba   :  { %v118_v13 = vpop.permute.xlu0 %117  ;;  %v861_v14 = vpop.eup %860  ;;  %v146_v16 = vmul.f32 %v1171_v3, %v123_v12 }
  0xbb   :  { %v863_v15 = vpop.eup %862  ;;  %v145_v17 = vmul.f32 %v1171_v3, %v118_v13 }
  0xbc   :  { %v808_v18 = vpack.c.bf16 %v861_v14, %v863_v15 }
  0xbd   :  { %v241_v19 = vpop.permute.xlu1 %240 }
  0xbe   :  { %v236_v20 = vpop.permute.xlu0 %235  ;;  %v258_v21 = vadd.f32 %v241_v19, %v146_v16  ;;  %809 = vmatprep.subr.bf16.mxu0 %v808_v18  ;;  %825 = vmatprep.subr.bf16.mxu1 %v808_v18 }
  0xbf   :  { %v257_v22 = vadd.f32 %v236_v20, %v145_v17  ;;  %811 = vmatpush3.bf16.msra.mxu0 %v808_v18  ;;  %833 = vmatpush3.bf16.msra.mxu1 %v808_v18 }
  0xc0   :  { %868 = vtanh.f32 %v258_v21 }
  0xc1   :  { %870 = vtanh.f32 %v257_v22  ;;  %v315_v43 = vpop.permute.xlu1 %314 }
  0xc2   :  { %v865_v23 = vpop.eup %864  ;;  %v310_v42 = vpop.permute.xlu0 %309 }
  0xc3   :  { %v867_v24 = vpop.eup %866 }
  0xc4   :  { %v812_v25 = vpack.c.bf16 %v865_v23, %v867_v24 }
  0xc5   :  { %v325_v45 = vpop.permute.xlu1 %324 }
  0xc6   :  { %813 = vmatprep.subr.bf16.mxu0 %v812_v25  ;;  %826 = vmatprep.subr.bf16.mxu1 %v812_v25  ;;  %v320_v44 = vpop.permute.xlu0 %319 }
  0xc7   :  { %815 = vmatpush3.bf16.msra.mxu0 %v812_v25  ;;  %834 = vmatpush3.bf16.msra.mxu1 %v812_v25 }
  0xc9   :  { %v335_v47 = vpop.permute.xlu1 %334 }
  0xca   :  { %v869_v26 = vpop.eup %868  ;;  %v330_v46 = vpop.permute.xlu0 %329 }
  0xcb   :  { %v871_v3 = vpop.eup %870 }
  0xcc   :  { %v816_v27 = vpack.c.bf16 %v869_v26, %v871_v3 }
  0xcd   :  { %v345_v49 = vpop.permute.xlu1 %344 }
  0xce   :  { %817 = vmatprep.subr.bf16.mxu0 %v816_v27  ;;  %827 = vmatprep.subr.bf16.mxu1 %v816_v27  ;;  %v340_v48 = vpop.permute.xlu0 %339 }
  0xcf   :  { %819 = vmatpush3.bf16.msra.mxu0 %v816_v27  ;;  %835 = vmatpush3.bf16.msra.mxu1 %v816_v27 }
  0xd1   :  { %v572_v51 = vpop.permute.xlu1 %571 }
  0xd2   :  { %765 = vmatmul.mubr.f32.vlgmr.msra.gmra.mrb[0].mxu0 %v276_v28  ;;  %777 = vmatmul.mubr.f32.vlgmr.msra.gmra.mrb[0].mxu1 %v284_v29  ;;  %v567_v50 = vpop.permute.xlu0 %566 }
  0xd3   :  { %767 = vmatprep.mubr.f32.mxu0 %v277_v30  ;;  %779 = vmatprep.mubr.f32.mxu1 %v285_v31 }
  0xd5   :  { %v577_v53 = vpop.permute.xlu1 %576 }
  0xd6   :  { %768 = vmatmul.mubr.f32.gmra.mrb[2].mxu0 %v278_v32  ;;  %780 = vmatmul.mubr.f32.gmra.mrb[2].mxu1 %v286_v33  ;;  %v350_v52 = vpop.permute.xlu0 %349 }
  0xd7   :  { %770 = vmatprep.mubr.f32.mxu0 %v279_v34  ;;  %782 = vmatprep.mubr.f32.mxu1 %v287_v35 }
  0xd9   :  { %v582_v55 = vpop.permute.xlu1 %581 }
  0xda   :  { %771 = vmatmul.mubr.f32.gmra.mrb[4].mxu0 %v280_v36  ;;  %783 = vmatmul.mubr.f32.gmra.mrb[4].mxu1 %v288_v37  ;;  %v355_v54 = vpop.permute.xlu0 %354 }
  0xdb   :  { %773 = vmatprep.mubr.f32.mxu0 %v281_v38  ;;  %785 = vmatprep.mubr.f32.mxu1 %v289_v39 }
  0xdd   :  { %v587_v57 = vpop.permute.xlu1 %586 }
  0xde   :  { %774 = vmatmul.mubr.f32.gmra.mrb[6].mxu0 %v282_v40  ;;  %786 = vmatmul.mubr.f32.gmra.mrb[6].mxu1 %v290_v41  ;;  %v360_v56 = vpop.permute.xlu0 %359 }
  0xe1   :  { %v1231_v59 = vpop.permute.xlu1 %591 }
  0xe2   :  { %v365_v58 = vpop.permute.xlu0 %364 }
  0xe5   :  { %v597_v10 = vpop.permute.xlu1 %596 }
  0xe6   :  { %v370_v2 = vpop.permute.xlu0 %369 }
  0xe9   :  { %v602_v3 = vpop.permute.xlu1 %601 }
  0xea   :  { %v375_v17 = vpop.permute.xlu0 %374 }
  0xed   :  { %v607_v36 = vpop.permute.xlu1 %606 }
  0xee   :  { %v380_v33 = vpop.permute.xlu0 %379 }
 0x1a5   :  { %v766_v60 = vpop.f32.mrb[0].mxu0  ;;  %v778_v61 = vpop.f32.mrb[0].mxu1 }
 0x1a6   :  { %v459_v62 = vadd.f32 %v766_v60, %v315_v43  ;;  %v453_v63 = vpop.f32.mrb[1].mxu0  ;;  %v493_v0 = vpop.f32.mrb[1].mxu1  ;;  %v499_v29 = vadd.f32 %v778_v61, %v355_v54 }
 0x1a7   :  { %v454_v1 = vadd.f32 %v453_v63, %v310_v42  ;;  %v494_v27 = vadd.f32 %v493_v0, %v350_v52 }
 0x1a8   :  { %872 = vtanh.f32 %v459_v62 }
 0x1a9   :  { %v769_v4 = vpop.f32.mrb[2].mxu0  ;;  %v781_v5 = vpop.f32.mrb[2].mxu1  ;;  %874 = vtanh.f32 %v454_v1 }
 0x1aa   :  { %v469_v6 = vadd.f32 %v769_v4, %v325_v45  ;;  %v463_v7 = vpop.f32.mrb[3].mxu0  ;;  %v503_v8 = vpop.f32.mrb[3].mxu1  ;;  %v509_v37 = vadd.f32 %v781_v5, %v365_v58 }
 0x1ab   :  { %v464_v9 = vadd.f32 %v463_v7, %v320_v44  ;;  %v504_v34 = vadd.f32 %v503_v8, %v360_v56  ;;  %v385_v45 = vpop.permute.xlu0 %384 }
 0x1ac   :  { %876 = vtanh.f32 %v469_v6 }
 0x1ad   :  { %v772_v11 = vpop.f32.mrb[4].mxu0  ;;  %v784_v12 = vpop.f32.mrb[4].mxu1  ;;  %878 = vtanh.f32 %v464_v9 }
 0x1ae   :  { %v479_v13 = vadd.f32 %v772_v11, %v335_v47  ;;  %v473_v14 = vpop.f32.mrb[5].mxu0  ;;  %v513_v15 = vpop.f32.mrb[5].mxu1 }
 0x1af   :  { %v474_v16 = vadd.f32 %v473_v14, %v330_v46  ;;  %v514_v42 = vadd.f32 %v513_v15, %v370_v2  ;;  %v519_v46 = vadd.f32 %v784_v12, %v375_v17  ;;  %v617_v61 = vpop.permute.xlu0 %616 }
 0x1b0   :  { %880 = vtanh.f32 %v479_v13 }
 0x1b1   :  { %v775_v18 = vpop.f32.mrb[6].mxu0  ;;  %v787_v19 = vpop.f32.mrb[6].mxu1  ;;  %882 = vtanh.f32 %v474_v16 }
 0x1b2   :  { %v873_v20 = vpop.eup %872  ;;  %v489_v21 = vadd.f32 %v775_v18, %v345_v49  ;;  %v483_v22 = vpop.f32.mrb[7].mxu0  ;;  %v529_v56 = vadd.f32 %v787_v19, %v385_v45 }
 0x1b3   :  { %v523_v23 = vpop.f32.mrb[7].mxu1  ;;  %v645_v24 = vmul.f32 %v873_v20, %v572_v51  ;;  %v484_v25 = vadd.f32 %v483_v22, %v340_v48  ;;  %v875_v26 = vpop.eup %874 }
 0x1b4   :  { %v644_v28 = vmul.f32 %v875_v26, %v567_v50  ;;  %884 = vtanh.f32 %v489_v21  ;;  %v612_v51 = vpop.permute.xlu1 %611  ;;  %v524_v52 = vadd.f32 %v523_v23, %v380_v33  ;;  %v627_v8 = vpop.permute.xlu0 %626 }
 0x1b5   :  { %886 = vtanh.f32 %v484_v25 }
 0x1b6   :  { %v877_v30 = vpop.eup %876  ;;  %v660_v31 = vadd.f32 %v645_v24, %v644_v28  ;;  %888 = vtanh.f32 %v494_v27 }
 0x1b7   :  { %v879_v32 = vpop.eup %878  ;;  %890 = vtanh.f32 %v499_v29  ;;  %v647_v39 = vmul.f32 %v877_v30, %v582_v55  ;;  %v682_v30 = vstv %s1255_s6 }
 0x1b8   :  { %v646_v35 = vmul.f32 %v879_v32, %v577_v53  ;;  %892 = vtanh.f32 %v504_v34  ;;  %v622_v1 = vpop.permute.xlu1 %621  ;;  %v637_v19 = vpop.permute.xlu0 %636 }
 0x1b9   :  { %894 = vtanh.f32 %v509_v37 }
 0x1ba   :  { %v881_v38 = vpop.eup %880  ;;  %v661_v40 = vadd.f32 %v660_v31, %v646_v35  ;;  %896 = vtanh.f32 %v514_v42 }
 0x1bb   :  { %v883_v41 = vpop.eup %882  ;;  %v649_v48 = vmul.f32 %v881_v38, %v1231_v59  ;;  %898 = vtanh.f32 %v519_v46 }
 0x1bc   :  { %v648_v43 = vmul.f32 %v883_v41, %v587_v57  ;;  %v662_v44 = vadd.f32 %v661_v40, %v647_v39  ;;  %900 = vtanh.f32 %v524_v52  ;;  %v632_v12 = vpop.permute.xlu1 %631 }
 0x1bd   :  { %902 = vtanh.f32 %v529_v56 }
 0x1be   :  { %v885_v47 = vpop.eup %884  ;;  %v663_v49 = vadd.f32 %v662_v44, %v648_v43 }
 0x1bf   :  { %v887_v50 = vpop.eup %886  ;;  %v651_v58 = vmul.f32 %v885_v47, %v602_v3 }
 0x1c0   :  { %v650_v53 = vmul.f32 %v887_v50, %v597_v10  ;;  %v664_v54 = vadd.f32 %v663_v49, %v649_v48  ;;  %v889_v55 = vpop.eup %888  ;;  %v642_v22 = vpop.permute.xlu1 %641 }
 0x1c1   :  { %v891_v57 = vpop.eup %890  ;;  %v652_v62 = vmul.f32 %v889_v55, %v607_v36 }
 0x1c2   :  { %v665_v60 = vadd.f32 %v664_v54, %v650_v53  ;;  %v893_v0 = vpop.eup %892  ;;  %v653_v59 = vmul.f32 %v891_v57, %v612_v51 }
 0x1c3   :  { %v895_v4 = vpop.eup %894  ;;  %v654_v5 = vmul.f32 %v893_v0, %v617_v61 }
 0x1c4   :  { %v666_v63 = vadd.f32 %v665_v60, %v651_v58  ;;  %v897_v7 = vpop.eup %896  ;;  %v655_v9 = vmul.f32 %v895_v4, %v622_v1 }
 0x1c5   :  { %v899_v11 = vpop.eup %898  ;;  %v656_v13 = vmul.f32 %v897_v7, %v627_v8 }
 0x1c6   :  { %v667_v2 = vadd.f32 %v666_v63, %v652_v62  ;;  %v901_v15 = vpop.eup %900  ;;  %v657_v16 = vmul.f32 %v899_v11, %v632_v12 }
 0x1c7   :  { %v903_v18 = vpop.eup %902  ;;  %v658_v20 = vmul.f32 %v901_v15, %v637_v19 }
 0x1c8   :  { %v668_v6 = vadd.f32 %v667_v2, %v653_v59  ;;  %v659_v23 = vmul.f32 %v903_v18, %v642_v22 }
 0x1ca   :  { %v669_v10 = vadd.f32 %v668_v6, %v654_v5 }
 0x1cc   :  { %v670_v14 = vadd.f32 %v669_v10, %v655_v9 }
 0x1ce   :  { %v671_v17 = vadd.f32 %v670_v14, %v656_v13 }
 0x1d0   :  { %v672_v21 = vadd.f32 %v671_v17, %v657_v16 }
 0x1d2   :  { %v673_v24 = vadd.f32 %v672_v21, %v658_v20 }
 0x1d4   :  { %v674_v25 = vadd.f32 %v673_v24, %v659_v23 }
 0x1d6   :  { %v675_v26 = vrot.slane %v674_v25, 4 }
 0x1d8   :  { %v676_v3 = vadd.f32 %v675_v26, %v674_v25 }
 0x1da   :  { %v677_v27 = vrot.slane %v676_v3, 2 }
 0x1dc   :  { %v678_v28 = vadd.f32 %v677_v27, %v676_v3 }
 0x1de   :  { %v679_v29 = vrot.slane %v678_v28, 1 }
 0x1e0   :  { %v680_v31 = vadd.f32 %v679_v29, %v678_v28 }
 0x1e2   :  { %v683_v32 = vadd.f32 %v682_v30, %v680_v31 }
 0x1e4   :  { %684 = vst [vmem:[#allocation3] sm:$0x1] %v683_v32 }
 0x1e5   :  { %915 = shalt.err (!%p912_p4)
}
 0x1e6   :  { %s916_s18 = scalar_lea.hbm %s1256_s7, 16 }
 0x1e7   :  { %p917_p5 = scmp.ne.s32.totalorder %s1256_s7, %s916_s18  ;;  %p920_p6 = scmp.lt.u32.totalorder %s916_s18, %s1256_s7 }
 0x1e9   :  { %p922_p7 = pnand %p920_p6, %p917_p5 }
 0x1eb   :  { %925 = shalt.err (!%p922_p7)
}
 0x1ec   :  { %694 = dma.vmem_to_hbm [thread:$0]  %s692_s13, 16, %s1256_s7, [#allocation4]  }
 0x1ed   :  { %926 = dma.done.wait [#allocation4], 16  }
 0x1ee   :  { %927 = vsyncadd [#allocation4], 4294967280 }
 0x1ef   :  { %698 = vsyncpa [#allocation4], 1 }

</bundles_post_ra>
